<compile_context>
chip_gen: v6e
topology: v6e:2x2x1
jax: 0.10.0
libtpu: 0.0.40
codegen_flags: <defaults>
</compile_context>

<pallas_src>
import functools

import jax
import jax.numpy as jnp
from jax.experimental import pallas as pl
from jax.experimental.pallas import tpu as pltpu


def _layernorm_kernel(x_ref, g_ref, o_ref, *, eps, inv_c):
    # x_ref: (bn, C, T) -- channels on sublanes, spatial chunk on lanes.
    # g_ref: (C, 1)     -- per-channel scale, broadcast over batch and lanes.
    x = x_ref[...].astype(jnp.float32)
    s = jnp.sum(x, axis=1, keepdims=True)                      # (bn, 1, T)
    ss = jnp.sum(x * x, axis=1, keepdims=True)                 # (bn, 1, T)
    mean = s * inv_c
    # Single-pass population variance (unbiased=False); f32 stats, clamp tiny
    # negative values arising from cancellation.
    var = jnp.maximum(ss * inv_c - mean * mean, 0.0)
    inv = jax.lax.rsqrt(var + eps)                             # EUP rsqrt (free slot)
    g = g_ref[...].astype(jnp.float32)                         # (C, 1) -> (1, C, 1)
    o_ref[...] = ((x - mean) * inv * g).astype(o_ref.dtype)


def _chip_vmem_budget():
    """Returns (buffer+temp budget bytes, physical VMEM bytes) for this chip."""
    phys = None
    try:
        phys = int(pltpu.get_tpu_info().vmem_capacity_bytes)
    except Exception:
        phys = None
    if not phys or phys < (32 << 20):
        kind = ""
        try:
            kind = jax.devices()[0].device_kind.lower()
        except Exception:
            pass
        if "v5" in kind or "v6" in kind:
            phys = 128 << 20          # v5e / v5p / v6e
        else:
            phys = 64 << 20           # v7x and unknown: be conservative
    # Use ~55% of physical VMEM for this kernel's buffers + in-body temporaries.
    # -> ~35 MiB on v7x (64 MiB phys), ~70 MiB on v5e/v6e (128 MiB phys).
    budget = min(int(phys * 0.55), 80 << 20)
    return budget, phys


def _choose_tiles(N, C, hw, itemsize, budget, tile_hw=None, batch_tile=None):
    # VMEM per block element: 2x input + 2x output buffers (double buffered, input
    # dtype) + ~2 block-sized f32 temporaries created by the kernel body.
    per_elem_bytes = 4 * itemsize + 2 * 4
    max_elems = max(budget // per_elem_bytes, C * 128)

    # Lane (H*W) tile: prefer the full, fully-contiguous row; otherwise a large
    # multiple of 128 lanes (unmasked stores, efficient strided DMA).
    if tile_hw is not None:
        thw = max(1, min(int(tile_hw), hw))
        if thw < hw:
            thw = max(128, (thw // 128) * 128)
    elif C * hw <= max_elems:
        thw = hw
    else:
        thw = max(128, ((max_elems // C) // 128) * 128)
        if thw >= hw:
            thw = hw

    # Batch tile: pack as many (C, thw) slices as fit the budget (each slice is
    # contiguous in HBM, so the block is one large contiguous DMA when thw == hw).
    if batch_tile is not None:
        bn = max(1, min(int(batch_tile), N))
    else:
        bn = max(1, min(N, max_elems // max(C * thw, 1)))

    # Guarantee >= 2 grid steps when splittable so both v7x TensorCores get work.
    if tile_hw is None and batch_tile is None:
        steps = (-(-N // bn)) * (-(-hw // thw))
        if steps < 2:
            if N >= 2:
                bn = -(-N // 2)
            elif thw == hw and hw >= 256:
                half = -(-hw // 2)
                new_thw = max(128, ((half + 127) // 128) * 128)
                if new_thw < hw:
                    thw = new_thw
    return bn, thw


def layernorm_pallas(x_nchw, g_param, *, tile_hw=None, batch_tile=None):
    """x_nchw: (N, C, H, W); g_param: (1, C, 1, 1). Returns (N, C, H, W)."""
    N, C, H, W = x_nchw.shape
    hw = H * W
    # eps rule from the PyTorch module: 1e-5 for float32, 1e-3 otherwise.
    eps = 1e-5 if x_nchw.dtype == jnp.float32 else 1e-3

    # Free view of the native NCHW memory layout (no transpose, no extra HBM traffic).
    x3 = x_nchw.reshape(N, C, hw)
    g2 = g_param.reshape(C, 1)
    itemsize = jnp.dtype(x_nchw.dtype).itemsize

    budget, phys = _chip_vmem_budget()
    bn, thw = _choose_tiles(N, C, hw, itemsize, budget,
                            tile_hw=tile_hw, batch_tile=batch_tile)
    grid = (pl.cdiv(N, bn), pl.cdiv(hw, thw))

    # vmem_limit derived from the actual per-block requirement (buffers + f32 temps
    # + margin), never clamped below it; capped below physical VMEM.
    block_elems = bn * C * thw
    requirement = block_elems * (4 * itemsize + 2 * 4) + (2 << 20)
    vmem_limit = int(min(max(requirement, 16 << 20), phys - (8 << 20)))

    out3 = pl.pallas_call(
        functools.partial(_layernorm_kernel, eps=eps, inv_c=1.0 / C),
        out_shape=jax.ShapeDtypeStruct((N, C, hw), x_nchw.dtype),
        grid=grid,
        in_specs=[
            pl.BlockSpec((bn, C, thw), lambda i, j: (i, 0, j)),  # x block
            pl.BlockSpec((C, 1), lambda i, j: (0, 0)),           # g broadcast
        ],
        out_specs=pl.BlockSpec((bn, C, thw), lambda i, j: (i, 0, j)),
        compiler_params=pltpu.CompilerParams(
            dimension_semantics=("parallel", "parallel"),
            vmem_limit_bytes=vmem_limit,
        ),
    )(x3, g2)

    return out3.reshape(N, C, H, W)


def layernorm_ref(x, g):
    eps = 1e-5 if x.dtype == jnp.float32 else 1e-3
    xf = x.astype(jnp.float32)
    mean = jnp.mean(xf, axis=1, keepdims=True)
    var = jnp.mean((xf - mean) ** 2, axis=1, keepdims=True)
    return ((xf - mean) * jax.lax.rsqrt(var + eps) * g.astype(jnp.float32)).astype(x.dtype)


if __name__ == "__main__":
    key = jax.random.PRNGKey(0)
    N, C, H, W = 2, 4, 16, 16
    x = jax.random.normal(key, (N, C, H, W), dtype=jnp.float32)
    # parameter init matches nn.Parameter(torch.ones(1, dim, 1, 1))
    g = jnp.ones((1, C, 1, 1), dtype=jnp.float32)

    out = jax.block_until_ready(layernorm_pallas(x, g))
    ref = layernorm_ref(x, g)
    assert out.shape == (N, C, H, W)
    assert jnp.allclose(out, ref, atol=1e-4, rtol=1e-4), "mismatch vs reference"

    # Non-divisible spatial extent: HW=400 with a 128-lane tile exercises the
    # pl.cdiv grid + masked partial last block.
    x2 = jax.random.normal(jax.random.PRNGKey(1), (2, C, 20, 20), dtype=jnp.float32)
    out2 = jax.block_until_ready(layernorm_pallas(x2, g, tile_hw=128))
    ref2 = layernorm_ref(x2, g)
    assert jnp.allclose(out2, ref2, atol=1e-4, rtol=1e-4), "mismatch vs reference (tail case)"

    # bf16 path exercises the eps=1e-3 rule; statistics stay f32 in-kernel.
    x3 = jax.random.normal(jax.random.PRNGKey(2), (2, C, H, W), dtype=jnp.bfloat16)
    out3 = jax.block_until_ready(layernorm_pallas(x3, g.astype(jnp.bfloat16)))
    ref3 = layernorm_ref(x3, g.astype(jnp.bfloat16))
    assert jnp.allclose(out3.astype(jnp.float32), ref3.astype(jnp.float32),
                        atol=5e-2, rtol=5e-2), "mismatch vs reference (bf16)"

    print("KERNEL_OK")
</pallas_src>

<mosaic_0001>
module attributes {stable_mosaic.version = 11 : i64} {
  func.func @_layernorm_kernel(%arg0: i32, %arg1: i32, %arg2: memref<1x4x256xf32, #tpu.memory_space<vmem>>, %arg3: memref<4x1xf32, #tpu.memory_space<vmem>>, %arg4: memref<1x4x256xf32, #tpu.memory_space<vmem>>) attributes {dimension_semantics = [#tpu.dimension_semantics<parallel>, #tpu.dimension_semantics<parallel>], iteration_bounds = array<i64: 2, 1>, scalar_prefetch = 0 : i64, scratch_operands = 0 : i64, tpu.core_type = #tpu.core_type<tc>, window_params = [{transform_indices = @transform_0, window_bounds = array<i64: 1, 4, 256>}, {pipeline_mode = #tpu.pipeline_mode<synchronous>, transform_indices = @transform_1, window_bounds = array<i64: 4, 1>}, {transform_indices = @transform_2, window_bounds = array<i64: 1, 4, 256>}]} {
    %c0 = arith.constant 0 : index
    %c0_0 = arith.constant 0 : index
    %c0_1 = arith.constant 0 : index
    %0 = vector.load %arg2[%c0, %c0_0, %c0_1] : memref<1x4x256xf32, #tpu.memory_space<vmem>>, vector<1x4x256xf32>
    %cst = arith.constant dense<0.000000e+00> : vector<1x256xf32>
    %1 = vector.multi_reduction <add>, %0, %cst [1] : vector<1x4x256xf32> to vector<1x256xf32>
    %2 = vector.shape_cast %1 : vector<1x256xf32> to vector<1x1x256xf32>
    %3 = arith.mulf %0, %0 : vector<1x4x256xf32>
    %cst_2 = arith.constant dense<0.000000e+00> : vector<1x256xf32>
    %4 = vector.multi_reduction <add>, %3, %cst_2 [1] : vector<1x4x256xf32> to vector<1x256xf32>
    %5 = vector.shape_cast %4 : vector<1x256xf32> to vector<1x1x256xf32>
    %cst_3 = arith.constant 2.500000e-01 : f32
    %6 = vector.broadcast %cst_3 : f32 to vector<1x1x256xf32>
    %7 = arith.mulf %2, %6 : vector<1x1x256xf32>
    %cst_4 = arith.constant 2.500000e-01 : f32
    %8 = vector.broadcast %cst_4 : f32 to vector<1x1x256xf32>
    %9 = arith.mulf %5, %8 : vector<1x1x256xf32>
    %10 = arith.mulf %7, %7 : vector<1x1x256xf32>
    %11 = arith.subf %9, %10 : vector<1x1x256xf32>
    %cst_5 = arith.constant 0.000000e+00 : f32
    %12 = vector.broadcast %cst_5 : f32 to vector<1x1x256xf32>
    %13 = arith.maximumf %11, %12 : vector<1x1x256xf32>
    %cst_6 = arith.constant 9.99999974E-6 : f32
    %14 = vector.broadcast %cst_6 : f32 to vector<1x1x256xf32>
    %15 = arith.addf %13, %14 : vector<1x1x256xf32>
    %16 = math.rsqrt %15 : vector<1x1x256xf32>
    %c0_7 = arith.constant 0 : index
    %c0_8 = arith.constant 0 : index
    %17 = vector.load %arg3[%c0_7, %c0_8] : memref<4x1xf32, #tpu.memory_space<vmem>>, vector<4x1xf32>
    %18 = vector.broadcast %7 : vector<1x1x256xf32> to vector<1x4x256xf32>
    %19 = arith.subf %0, %18 : vector<1x4x256xf32>
    %20 = vector.broadcast %16 : vector<1x1x256xf32> to vector<1x4x256xf32>
    %21 = arith.mulf %19, %20 : vector<1x4x256xf32>
    %22 = vector.shape_cast %17 : vector<4x1xf32> to vector<1x4x1xf32>
    %23 = vector.broadcast %22 : vector<1x4x1xf32> to vector<1x4x256xf32>
    %24 = arith.mulf %21, %23 : vector<1x4x256xf32>
    %c0_9 = arith.constant 0 : index
    %c0_10 = arith.constant 0 : index
    %c0_11 = arith.constant 0 : index
    %25 = vector.load %arg4[%c0_9, %c0_10, %c0_11] : memref<1x4x256xf32, #tpu.memory_space<vmem>>, vector<1x4x256xf32>
    tpu.vector_store %arg4[%c0_9, %c0_10, %c0_11], %24 {strides = array<i32>} : memref<1x4x256xf32, #tpu.memory_space<vmem>>, vector<1x4x256xf32>,
    return
  }
  func.func @transform_0(%arg0: i32, %arg1: i32) -> (i32, i32, i32) {
    %c0_i32 = arith.constant 0 : i32
    %c0_i32_0 = arith.constant 0 : i32
    return %arg0, %c0_i32, %arg1 : i32, i32, i32
  }
  func.func @transform_1(%arg0: i32, %arg1: i32) -> (i32, i32) {
    %c0_i32 = arith.constant 0 : i32
    %c0_i32_0 = arith.constant 0 : i32
    %c0_i32_1 = arith.constant 0 : i32
    return %c0_i32, %c0_i32_0 : i32, i32
  }
  func.func @transform_2(%arg0: i32, %arg1: i32) -> (i32, i32, i32) {
    %c0_i32 = arith.constant 0 : i32
    %c0_i32_0 = arith.constant 0 : i32
    return %arg0, %c0_i32, %arg1 : i32, i32, i32
  }
}

</mosaic_0001>

<bundles_post_ra>
// kernel: tpu_custom_call.1
= control target key start
LH: loop header
LB: loop body
LE: loop exit
PB: predicated region body
PF: predicated region fallthrough
CT: control target
= control target key end

     0   :  { %7 = vsyncpa [#allocation3], 0  ;;  %s714_s0 = inlined_call_operand.hbm [shape: f32[2,4,256], index: 0, kind: input, shape index: {}]   ;;  %s715_s1 = inlined_call_operand.vmem [shape: f32[4,1], index: 1, kind: input, shape index: {}]   ;;  %s716_s2 = inlined_call_operand.hbm [shape: f32[2,4,256], index: 2, kind: output, shape index: {}]  }
   0x1   :  { %9 = vsyncpa [#allocation3 + $0x1], 0 }
   0x2   :  { %10 = vsyncpa [#allocation4], 0 }
   0x3   :  { %12 = vsyncpa [#allocation4 + $0x1], 0  ;;  %s573_s9 = smov 0   ;;  %s575_s10 = smov 0  }
   0x4   :  { %s577_s11 = smov 0   ;;  %s579_s12 = smov 0  }
   0x5   :  { %s581_s13 = smov 0   ;;  %s583_s14 = smov 0  }
   0x6 LB: > { %s357_s15 = sadd.s32 4294967295, %s552_s14   ;;  %s358_s16 = sadd.s32 4294967294, %s552_s14   ;;  %s552_s14 = sphi %s583_s14, %s18_s14   ;;  %s548_s13 = sphi %s581_s13, %s728_s13   ;;  %s544_s12 = sphi %s579_s12, %s727_s12   ;;  %s540_s11 = sphi %s577_s11, %s726_s11   ;;  %s536_s10 = sphi %s575_s10, %s725_s10   ;;  %s532_s9 = sphi %s573_s9, %s724_s9  }
   0x7   : > { %s30_s17 = sadd.s32 1, %s548_s13  ;;  %s39_s18 = sadd.s32 1, %s540_s11 }
   0x8   : > { %p32_p0 = scmp.ge.s32.totalorder %s30_s17, 2  ;;  %p46_p1 = scmp.ne.s32.totalorder %s540_s11, %s536_s10 }
   0x9   : > { %p47_p2 = scmp.eq.s32.totalorder %s552_s14, 0  ;;  %p52_p3 = scmp.ne.s32.totalorder %s536_s10, %s532_s9 }
   0xa   : > { %s730_s17 = smov (%p32_p0, %s30_s17), 0  ;;  %p53_p5 = scmp.eq.s32.totalorder %s357_s15, 0 }
   0xb   : > { %p614_p4 = por %p47_p2, %p46_p1  ;;  %s34_s20 = ssub.s32 %s548_s13, %s730_s17 }
   0xc   : > { %p99_p6 = scmp.eq.s32.totalorder %s357_s15, 1  ;;  %p37_p7 = scmp.eq.s32.totalorder %s34_s20, 0 }
   0xd   : > { %p620_p8 = por %p53_p5, %p52_p3  ;;  %p105_p10 = scmp.eq.s32.totalorder %s358_s16, 1 }
   0xe   : > { %p624_p9 = por %p99_p6, %p46_p1  ;;  %p386_p13 = scmp.lt.s32.totalorder %s552_s14, 2 }
   0xf   : > { %s629_s23 = scalar_select %p37_p7, %s540_s11, %s39_s18  }
  0x10   : > { %p631_p11 = por %p105_p10, %p52_p3  ;;  %s128_s25 = sand.u32 1, %s540_s11  }
  0x11   : > { %s361_s26 = sshll.u32 %s128_s25, 3  ;;  %s372_s27 = sshll.u32 %s548_s13, 7 }
  0x12   : > { %s720_s24 = scalar_select %p631_p11, 1, 0 }
  0x13   : > { %s140_s30 = scalar_lea.hbm %s714_s0, %s372_s27  ;;  %s132_s3 = scalar_lea.vmem [#allocation2], %s361_s26 }
  0x14   : > { %s142_s4 = sshll.u32 %s132_s3, 4  ;;  %p644_p0 = pnand %p386_p13, %p614_p4  ;;  %s143_s4 = int_to_ptr.vmem [resolvable:$true] %s142_s4 }
  0x15   : > { %p364_p1 = scmp.ge.s32.totalorder %s552_s14, 1  ;;  %p147_p2 = scmp.lt.s32.totalorder %s552_s14, 3 }
  0x16   : > { %s129_s6 = scalar_lea.sflag [#allocation3], %s128_s25  ;;  %p446_p3 = pneg %p644_p0 }
  0x17   : > { %s457_s7 = scalar_lea.vmem %s143_s4, 128  ;;  %s554_s8 = smov [#allocation2]  }
  0x18   : > { %p458_p5 = scmp.ne.s32.totalorder %s143_s4, %s457_s7  ;;  %s462_s15 = sshll.u32 %s554_s8, 4  ;;  %s463_s15 = int_to_ptr.vmem [resolvable:$false] %s462_s15 }
  0x19   : > { %s464_s16 = scalar_lea.vmem %s463_s15, 256  ;;  %p465_p10 = scmp.lt.s32.totalorder %s143_s4, %s463_s15 }
  0x1a   : > { %p460_p6 = pnand %p458_p5, %p446_p3  ;;  %p466_p12 = scmp.lt.s32.totalorder %s464_s16, %s457_s7 }
  0x1c   : > { %p461_p7 = pneg %p460_p6  ;;  %p467_p4 = por %p466_p12, %p465_p10 }
  0x1e   : > { %p468_p13 = pnand %p467_p4, %p461_p7 }
  0x20   : > { %471 = shalt.err (!%p468_p13)
}
  0x21   : > { %381 = dma.hbm_to_vmem [thread:$0]  (!%p644_p0), %s140_s30, 128, %s143_s4, %s129_s6  }
  0x22   : > { %p148_p11 = pnand %p364_p1, %p147_p2 }
  0x23   : > { %s659_s18 = sand.u32 (!%p148_p11), 1, %s536_s10  }
  0x24   : > { %151 = sbr.rel (%p148_p11) target bundleno = 185 (0xb9), region = 28  ;;  %s365_s19 = sshll.u32 (!%p148_p11), %s659_s18, 3 }
  0x25   : > { %s154_s20 = scalar_lea.sflag (!%p148_p11), [#allocation3], %s659_s18  ;;  %s157_s25 = scalar_lea.vmem (!%p148_p11), [#allocation2], %s365_s19 }
  0x29   : > { %523 = dma.done.wait (%p620_p8), %s154_s20, 128  }
  0x2a   : > { %525 = vsyncadd (%p620_p8), %s154_s20, 4294967168  ;;  %v555_v0 = vmov 0   ;;  %v231_v1 = vld [vmem:[%s715_s1] sm:$0xf]  ;;  %vm184_vm0 = vcmask 1043456   ;;  %v249_v48 = vlaneseq  ;;  %s373_s21 = sshll.u32 %s544_s12, 7 }
  0x2b   : > { %438 = vset.pattern.permute.xlu0 %v555_v0  ;;  %v180_v2 = vld [vmem:[%s157_s25] sm:$0xff]  ;;  %v556_v46 = vmov 839922192   ;;  %s177_s28 = scalar_lea.vmem [#allocation5], %s365_s19  ;;  %s271_s4 = scalar_lea.hbm %s716_s2, %s373_s21 }
  0x2c   : > { %244 = vperm.xlu0 %438, %v231_v1   ;;  %v182_v3 = vcombine.high %v180_v2, %v180_v2  ;;  %v199_v4 = vmul.f32 %v180_v2, %v180_v2  ;;  %v185_v5 = vsel %vm184_vm0, %v180_v2, 0.0  ;;  %v247_v47 = vunpack.c.l.s4 %v556_v46  ;;  %s273_s29 = sshll.u32 %s177_s28, 4  ;;  %s257_s5 = scalar_lea.sflag [#allocation4], %s659_s18  ;;  %s274_s29 = int_to_ptr.vmem [resolvable:$true] %s273_s29 }
  0x2d   : > { %v186_v8 = vrot.slane %v185_v5, 4  ;;  %v250_v53 = vshrl.u32 %v249_v48, 7  ;;  %s472_s6 = scalar_lea.vmem %s274_s29, 128  ;;  %s557_s7 = smov [#allocation5]  }
  0x2e   : > { %v192_v6 = vsel %vm184_vm0, %v182_v3, 0.0  ;;  %v201_v7 = vcombine.high %v199_v4, %v199_v4  ;;  %v203_v10 = vsel %vm184_vm0, %v199_v4, 0.0  ;;  %v248_v52 = vunpack.c.0.s8 %v247_v47  ;;  %p473_p8 = scmp.ne.s32.totalorder %s274_s29, %s472_s6  ;;  %s476_s8 = sshll.u32 %s557_s7, 4  ;;  %s477_s8 = int_to_ptr.vmem [resolvable:$false] %s476_s8 }
  0x2f   : > { %v193_v9 = vrot.slane %v192_v6, 4  ;;  %v187_v12 = vadd.f32 %v186_v8, %v185_v5  ;;  %v204_v13 = vrot.slane %v203_v10, 4  ;;  %s478_s12 = scalar_lea.vmem %s477_s8, 256  ;;  %p479_p0 = scmp.lt.s32.totalorder %s274_s29, %s477_s8 }
  0x30   : > { %v210_v11 = vsel %vm184_vm0, %v201_v7, 0.0  ;;  %v251_v56 = vsub.s32 %v248_v52, %v250_v53  ;;  %p474_p11 = pnand %p473_p8, %p624_p9  ;;  %p480_p1 = scmp.lt.s32.totalorder %s478_s12, %s472_s6 }
  0x31   : > { %v194_v14 = vadd.f32 %v193_v9, %v192_v6  ;;  %v211_v15 = vrot.slane %v210_v11, 4  ;;  %v188_v16 = vrot.slane %v187_v12, 2  ;;  %v205_v17 = vadd.f32 %v204_v13, %v203_v10 }
  0x32   : > { %p475_p12 = pneg %p474_p11  ;;  %p481_p2 = por %p480_p1, %p479_p0 }
  0x33   : > { %v195_v18 = vrot.slane %v194_v14, 2  ;;  %v212_v19 = vadd.f32 %v211_v15, %v210_v11  ;;  %v189_v20 = vadd.f32 %v188_v16, %v187_v12  ;;  %v206_v21 = vrot.slane %v205_v17, 2 }
  0x34   : > { %p482_p3 = pnand %p481_p2, %p475_p12 }
  0x35   : > { %v196_v22 = vadd.f32 %v195_v18, %v194_v14  ;;  %v213_v23 = vrot.slane %v212_v19, 2  ;;  %v190_v24 = vrot.slane %v189_v20, 1  ;;  %v207_v25 = vadd.f32 %v206_v21, %v205_v17 }
  0x37   : > { %v197_v26 = vrot.slane %v196_v22, 1  ;;  %v214_v27 = vadd.f32 %v213_v23, %v212_v19  ;;  %v191_v28 = vadd.f32 %v190_v24, %v189_v20  ;;  %v208_v29 = vrot.slane %v207_v25, 1 }
  0x39   : > { %v198_v30 = vadd.f32 %v197_v26, %v196_v22  ;;  %v215_v31 = vrot.slane %v214_v27, 1  ;;  %v209_v32 = vadd.f32 %v208_v29, %v207_v25  ;;  %v217_v33 = vmul.f32 0.25, %v191_v28 }
  0x3b   : > { %v216_v34 = vadd.f32 %v215_v31, %v214_v27  ;;  %v218_v35 = vmul.f32 0.25, %v198_v30  ;;  %v219_v36 = vmul.f32 0.25, %v209_v32  ;;  %v221_v37 = vmul.f32 %v217_v33, %v217_v33 }
  0x3d   : > { %v220_v38 = vmul.f32 0.25, %v216_v34  ;;  %v222_v39 = vmul.f32 %v218_v35, %v218_v35  ;;  %v223_v40 = vsub.f32 %v219_v36, %v221_v37  ;;  %v234_v50 = vcombine.low %v217_v33, %v218_v35 }
  0x3f   : > { %v224_v41 = vsub.f32 %v220_v38, %v222_v39  ;;  %v225_v42 = vmax.f32 %v223_v40, 0.0  ;;  %v236_v54 = vsub.f32 %v180_v2, %v234_v50 }
  0x41   : > { %v226_v43 = vmax.f32 %v224_v41, 0.0  ;;  %v227_v44 = vadd.f32 1e-05, %v225_v42 }
  0x43   : > { %v228_v45 = vadd.f32 1e-05, %v226_v43  ;;  %440 = vrsqrt.f32 %v227_v44 }
  0x45   : > { %442 = vrsqrt.f32 %v228_v45 }
  0x50   : > { %v441_v49 = vpop.eup %440 }
  0x52   : > { %v443_v51 = vpop.eup %442 }
  0x53   : > { %v239_v55 = vcombine.low %v441_v49, %v443_v51 }
  0x55   : > { %v241_v57 = vmul.f32 %v239_v55, %v236_v54 }
  0xa7   : > { %v245_v58 = vpop.permute.xlu0 %244 }
  0xa8   : > { %v252_v59 = vrot.slane %v245_v58, %v251_v56 }
  0xaa   : > { %v254_v60 = vmul.f32 %v252_v59, %v241_v57 }
  0xac   : > { %255 = vst [vmem:[%s177_s28] sm:$0xff] %v254_v60 }
  0xad   : > { %485 = shalt.err (!%p482_p3)
}
  0xae   : > { %s486_s15 = scalar_lea.hbm %s271_s4, 128  ;;  %s490_s19 = scalar_lea.hbm %s716_s2, 256 }
  0xaf   : > { %p487_p5 = scmp.ne.s32.totalorder %s271_s4, %s486_s15  ;;  %p491_p10 = scmp.lt.s32.totalorder %s271_s4, %s716_s2 }
  0xb0   : > { %p492_p4 = scmp.lt.s32.totalorder %s490_s19, %s486_s15 }
  0xb1   : > { %p488_p6 = pnand %p487_p5, %p624_p9 }
  0xb2   : > { %p493_p13 = por %p492_p4, %p491_p10 }
  0xb3   : > { %p489_p7 = pneg %p488_p6 }
  0xb5   : > { %p494_p8 = pnand %p493_p13, %p489_p7 }
  0xb7   : > { %497 = shalt.err (!%p494_p8)
}
  0xb8   : > { %376 = dma.vmem_to_hbm [thread:$0]  (%p624_p9), %s274_s29, 128, %s271_s4, %s257_s5  }
  0xb9 PF: > { %s285_s26 = sand.u32 1, %s532_s9   ;;  %p722_p11 = scmp.ne.s32.totalorder %s720_s24, 0 }
  0xba   : > { %p723_p12 = scmp.ge.s32.totalorder %s552_s14, 2  ;;  %s286_s27 = scalar_lea.sflag [#allocation4], %s285_s26 }
  0xbc   : > { %p383_p0 = pnand %p723_p12, %p722_p11 }
  0xbe   : > { %p384_p1 = pneg %p383_p0 }
  0xc0   : > { %527 = dma.done.wait (%p384_p1), %s286_s27, 128  }
  0xc1   : > { %529 = vsyncadd (%p384_p1), %s286_s27, 4294967168  ;;  %s18_s14 = sadd.s32 1, %s552_s14   ;;  %s724_s9 = smov %s536_s10 }
  0xc2   : > { %p15_p2 = scmp.ge.s32.totalorder %s18_s14, 4   ;;  %s725_s10 = smov %s540_s11 }
  0xc3   : > { %s726_s11 = smov %s629_s23  ;;  %s727_s12 = smov %s548_s13 }
  0xc4   : > { %s728_s13 = smov %s730_s17  ;;  %17 = sbr.rel (!%p15_p2) target bundleno = 6 (0x6), region = 73 }
  0xc9   :  { %291 = vsyncpa [#allocation3], 1 }
  0xca   :  { %293 = vsyncpa [#allocation3 + $0x1], 1 }
  0xcb   :  { %294 = vsyncpa [#allocation4], 1 }
  0xcc   :  { %296 = vsyncpa [#allocation4 + $0x1], 1 }

</bundles_post_ra>
